<compile_context>
chip_gen: v7x
topology: tpu7x:2x2x1
jax: 0.10.0
libtpu: 0.0.40
codegen_flags: <defaults>
</compile_context>

<pallas_src>
import functools

import jax
import jax.numpy as jnp
from jax.experimental import pallas as pl
from jax.experimental.pallas import tpu as pltpu

LANE = 128  # TPU lane width; hidden / fused-head output dims are padded to this.


def _round_up(x, m):
    return (x + m - 1) // m * m


def net_kernel(x_ref, w_ref, b_ref, out_ref, *, k_pad):
    # x arrives f32 (no wrapper-side convert op); cast to bf16 on the VPU here.
    x = x_ref[...].astype(jnp.bfloat16)

    # Shared trunk: Linear + ReLU.  Static Ref slice of the packed weight slab
    # is a zero-cost view; bf16 x bf16 MXU, f32 accumulate, f32 epilogue (v5e
    # has no bf16 VPU path).
    h = jnp.dot(x, w_ref[:k_pad, :], preferred_element_type=jnp.float32)
    h = jnp.maximum(h + b_ref[0:1, :], 0.0)

    # Fused actor + critic head: one (bm, 128) x (128, 128) matmul, one
    # lane-dense store.  Keep h in f32 (avoid a second bf16 rounding step).
    wh = w_ref[k_pad:, :].astype(jnp.float32)
    out = jnp.dot(h, wh, preferred_element_type=jnp.float32)
    out_ref[...] = out + b_ref[1:2, :]


def pack_params(params, n_action):
    """Pack (in, out)-layout params into ONE lane-dense bf16 weight slab and
    ONE (2, 128) f32 bias slab -> only 2 parameter DMAs per pallas_call."""
    l_obs, l1 = params["w1_t"].shape
    assert l1 <= LANE and n_action + 1 <= LANE
    # Split point of the slab; multiple of 16 keeps the bf16 sublane packing
    # aligned for both static slices inside the kernel.
    k_pad = _round_up(l_obs, 16)

    w = jnp.zeros((k_pad + LANE, LANE), jnp.float32)
    w = w.at[:l_obs, :l1].set(params["w1_t"])                              # trunk
    w = w.at[k_pad:k_pad + l1, :n_action].set(params["wa_t"])              # actor
    w = w.at[k_pad:k_pad + l1, n_action:n_action + 1].set(params["wc_t"])  # critic

    b = jnp.zeros((2, LANE), jnp.float32)
    b = b.at[0, :l1].set(params["b1"][0])
    b = b.at[1, :n_action].set(params["ba"][0])
    b = b.at[1, n_action].set(params["bc"][0, 0])

    return {"w": w.astype(jnp.bfloat16),  # matmul weights in bf16
            "b": b}                       # biases stay f32


@functools.partial(jax.jit, static_argnames=("n_action",))
def net_forward(inputs, packed, n_action):
    """inputs: [B, l_obs] float32.  packed: output of pack_params."""
    B, l_obs = inputs.shape
    w, b = packed["w"], packed["b"]
    k_pad = w.shape[0] - LANE  # static (shape-derived)

    # Batch tiling: row blocks over a single "parallel" grid axis (sharded
    # across v7x's two TensorCores for large B).  Weights/biases use constant
    # index_maps -> resident in VMEM across grid steps, no re-DMA.
    if B <= 512:
        bm = _round_up(B, 8)
        b_pad = bm
    else:
        bm = 512
        b_pad = _round_up(B, bm)

    x = inputs
    if b_pad != B or k_pad != l_obs:
        # Zero padding: padded feature columns hit zero weight rows; padded
        # batch rows are sliced away below.
        x = jnp.pad(x, ((0, b_pad - B), (0, k_pad - l_obs)))

    flops = 2 * b_pad * (k_pad * LANE + LANE * LANE)
    bytes_accessed = (x.size * 4 + w.size * 2 + b.size * 4 + b_pad * LANE * 4)

    out = pl.pallas_call(
        functools.partial(net_kernel, k_pad=k_pad),
        out_shape=jax.ShapeDtypeStruct((b_pad, LANE), jnp.float32),
        grid_spec=pltpu.PrefetchScalarGridSpec(
            num_scalar_prefetch=0,
            grid=(b_pad // bm,),
            in_specs=[
                pl.BlockSpec((bm, k_pad), lambda i: (i, 0)),           # activations
                pl.BlockSpec((k_pad + LANE, LANE), lambda i: (0, 0)),  # weight slab (resident)
                pl.BlockSpec((2, LANE), lambda i: (0, 0)),             # bias slab (resident)
            ],
            out_specs=pl.BlockSpec((bm, LANE), lambda i: (i, 0)),
        ),
        compiler_params=pltpu.CompilerParams(
            dimension_semantics=("parallel",)),
        cost_estimate=pl.CostEstimate(
            flops=flops, transcendentals=0, bytes_accessed=bytes_accessed),
    )(x, w, b)

    # Layout plumbing outside the kernel (free slices of the lane-dense slab).
    pi_out = out[:B, :n_action]
    v_out = out[:B, n_action:n_action + 1]
    return pi_out, v_out


def init_params(key, l_obs, l1, n_action):
    """Deterministic init mimicking PyTorch nn.Linear default (uniform +-1/sqrt(fan_in)).
    Weights are returned already transposed to (in, out)."""
    ks = jax.random.split(key, 6)

    def unif(k, shape, fan_in):
        bound = 1.0 / jnp.sqrt(jnp.float32(fan_in))
        return jax.random.uniform(k, shape, jnp.float32, -bound, bound)

    return {
        # trunk Linear(l_obs, l1)
        "w1_t": unif(ks[0], (l_obs, l1), l_obs),
        "b1":   unif(ks[1], (1, l1), l_obs),
        # actor Linear(l1, n_action)
        "wa_t": unif(ks[2], (l1, n_action), l1),
        "ba":   unif(ks[3], (1, n_action), l1),
        # critic Linear(l1, 1)
        "wc_t": unif(ks[4], (l1, 1), l1),
        "bc":   unif(ks[5], (1, 1), l1),
    }


if __name__ == "__main__":
    # Shapes consistent with the module: Net(l1=64, l2=16, l_obs=32, n_action=8)
    # (l2 is unused in the forward pass of the reference module.)
    B, l_obs, l1, l2, n_action = 8, 32, 64, 16, 8

    key = jax.random.PRNGKey(0)
    k_params, k_x = jax.random.split(key)

    params = init_params(k_params, l_obs, l1, n_action)
    packed = pack_params(params, n_action)
    x = jax.random.normal(k_x, (B, l_obs), jnp.float32)

    pi_out, v_out = net_forward(x, packed, n_action)
    jax.block_until_ready((pi_out, v_out))
    assert pi_out.shape == (B, n_action) and v_out.shape == (B, 1)

    # Reference 1: cast-matched pure-JAX reference (bf16 trunk operands,
    # bf16-rounded head weights, f32 head matmul -- same pattern as the kernel).
    x_bf = x.astype(jnp.bfloat16)
    w1_bf = params["w1_t"].astype(jnp.bfloat16)
    h_ref = jnp.maximum(
        jnp.dot(x_bf, w1_bf, preferred_element_type=jnp.float32) + params["b1"], 0.0)
    wa_f = params["wa_t"].astype(jnp.bfloat16).astype(jnp.float32)
    wc_f = params["wc_t"].astype(jnp.bfloat16).astype(jnp.float32)
    pi_ref = h_ref @ wa_f + params["ba"]
    v_ref = h_ref @ wc_f + params["bc"]
    assert jnp.allclose(pi_out, pi_ref, atol=1e-2)
    assert jnp.allclose(v_out, v_ref, atol=1e-2)

    # Reference 2: full-f32 reference of the original module (loose tol for bf16 trunk).
    h_f32 = jnp.maximum(x @ params["w1_t"] + params["b1"], 0.0)
    pi_f32 = h_f32 @ params["wa_t"] + params["ba"]
    v_f32 = h_f32 @ params["wc_t"] + params["bc"]
    assert jnp.allclose(pi_out, pi_f32, atol=5e-2)
    assert jnp.allclose(v_out, v_f32, atol=5e-2)

    print("KERNEL_OK")
</pallas_src>

<mosaic_0001>
module attributes {stable_mosaic.version = 11 : i64} {
  func.func @net_kernel(%arg0: i32, %arg1: memref<8x32xf32, #tpu.memory_space<vmem>>, %arg2: memref<160x128xbf16, #tpu.memory_space<vmem>>, %arg3: memref<2x128xf32, #tpu.memory_space<vmem>>, %arg4: memref<8x128xf32, #tpu.memory_space<vmem>>) attributes {dimension_semantics = [#tpu.dimension_semantics<parallel>], iteration_bounds = array<i64: 1>, scalar_prefetch = 0 : i64, scratch_operands = 0 : i64, tpu.core_type = #tpu.core_type<tc>, window_params = [{transform_indices = @transform_0, window_bounds = array<i64: 8, 32>}, {pipeline_mode = #tpu.pipeline_mode<synchronous>, transform_indices = @transform_1, window_bounds = array<i64: 160, 128>}, {pipeline_mode = #tpu.pipeline_mode<synchronous>, transform_indices = @transform_2, window_bounds = array<i64: 2, 128>}, {transform_indices = @transform_3, window_bounds = array<i64: 8, 128>}]} {
    %c0 = arith.constant 0 : index
    %c0_0 = arith.constant 0 : index
    %0 = vector.load %arg1[%c0, %c0_0] : memref<8x32xf32, #tpu.memory_space<vmem>>, vector<8x32xf32>
    %1 = arith.truncf %0 : vector<8x32xf32> to vector<8x32xbf16>
    %c0_1 = arith.constant 0 : index
    %c0_2 = arith.constant 0 : index
    %2 = vector.load %arg2[%c0_1, %c0_2] : memref<160x128xbf16, #tpu.memory_space<vmem>>, vector<32x128xbf16>
    %cst = arith.constant dense<0.000000e+00> : vector<8x128xf32>
    %3 = tpu.matmul %1, %2, %cst {dimension_numbers = #tpu.dot_dimension_numbers<[1], [0], [0], [1], [0, 0, 1, 1], [], []>} : vector<8x32xbf16>, vector<32x128xbf16>, vector<8x128xf32> -> vector<8x128xf32>
    %c0_3 = arith.constant 0 : index
    %c0_4 = arith.constant 0 : index
    %4 = vector.load %arg3[%c0_3, %c0_4] : memref<2x128xf32, #tpu.memory_space<vmem>>, vector<1x128xf32>
    %5 = vector.broadcast %4 : vector<1x128xf32> to vector<8x128xf32>
    %6 = arith.addf %3, %5 : vector<8x128xf32>
    %cst_5 = arith.constant 0.000000e+00 : f32
    %7 = vector.broadcast %cst_5 : f32 to vector<8x128xf32>
    %8 = arith.maximumf %6, %7 : vector<8x128xf32>
    %c32 = arith.constant 32 : index
    %c0_6 = arith.constant 0 : index
    %9 = vector.load %arg2[%c32, %c0_6] : memref<160x128xbf16, #tpu.memory_space<vmem>>, vector<128x128xbf16>
    %10 = arith.extf %9 : vector<128x128xbf16> to vector<128x128xf32>
    %cst_7 = arith.constant dense<0.000000e+00> : vector<8x128xf32>
    %11 = tpu.matmul %8, %10, %cst_7 {dimension_numbers = #tpu.dot_dimension_numbers<[1], [0], [0], [1], [0, 0, 1, 1], [], []>} : vector<8x128xf32>, vector<128x128xf32>, vector<8x128xf32> -> vector<8x128xf32>
    %c1 = arith.constant 1 : index
    %c0_8 = arith.constant 0 : index
    %12 = vector.load %arg3[%c1, %c0_8] : memref<2x128xf32, #tpu.memory_space<vmem>>, vector<1x128xf32>
    %13 = vector.broadcast %12 : vector<1x128xf32> to vector<8x128xf32>
    %14 = arith.addf %11, %13 : vector<8x128xf32>
    %c0_9 = arith.constant 0 : index
    %c0_10 = arith.constant 0 : index
    %15 = vector.load %arg4[%c0_9, %c0_10] : memref<8x128xf32, #tpu.memory_space<vmem>>, vector<8x128xf32>
    tpu.vector_store %arg4[%c0_9, %c0_10], %14 {strides = array<i32>} : memref<8x128xf32, #tpu.memory_space<vmem>>, vector<8x128xf32>,
    return
  }
  func.func @transform_0(%arg0: i32) -> (i32, i32) {
    %c0_i32 = arith.constant 0 : i32
    %c0_i32_0 = arith.constant 0 : i32
    return %arg0, %c0_i32 : i32, i32
  }
  func.func @transform_1(%arg0: i32) -> (i32, i32) {
    %c0_i32 = arith.constant 0 : i32
    %c0_i32_0 = arith.constant 0 : i32
    %c0_i32_1 = arith.constant 0 : i32
    return %c0_i32, %c0_i32_0 : i32, i32
  }
  func.func @transform_2(%arg0: i32) -> (i32, i32) {
    %c0_i32 = arith.constant 0 : i32
    %c0_i32_0 = arith.constant 0 : i32
    %c0_i32_1 = arith.constant 0 : i32
    return %c0_i32, %c0_i32_0 : i32, i32
  }
  func.func @transform_3(%arg0: i32) -> (i32, i32) {
    %c0_i32 = arith.constant 0 : i32
    %c0_i32_0 = arith.constant 0 : i32
    return %arg0, %c0_i32 : i32, i32
  }
}

</mosaic_0001>

<bundles_post_ra>
// kernel: net_forward.1
= control target key start
LH: loop header
LB: loop body
LE: loop exit
PB: predicated region body
PF: predicated region fallthrough
CT: control target
= control target key end

     0   :  { %8 = vsyncpa [#allocation3], 0  ;;  %s479_s0 = inlined_call_operand.hbm [shape: f32[8,32], index: 0, kind: input, shape index: {}]   ;;  %s480_s1 = inlined_call_operand.hbm [shape: bf16[160,128], index: 1, kind: input, shape index: {}]   ;;  %s481_s2 = inlined_call_operand.vmem [shape: f32[2,128], index: 2, kind: input, shape index: {}]   ;;  %s482_s3 = inlined_call_operand.vmem [shape: f32[8,128], index: 3, kind: output, shape index: {}]  }
   0x1   :  { %9 = vsyncpa [#allocation5], 0  ;;  %s412_s12 = smov [#allocation2]   ;;  %s413_s14 = smov [#allocation4]  }
   0x2   :  { %s16_s13 = sshll.u32 %s412_s12, 4  ;;  %s25_s15 = sshll.u32 %s413_s14, 4  ;;  %s17_s13 = int_to_ptr.vmem [resolvable:$true] %s16_s13  ;;  %s439_s15 = int_to_ptr.vmem [resolvable:$true] %s25_s15 }
   0x3   :  { %s364_s18 = scalar_lea.hbm %s479_s0, 128 }
   0x4   :  { %p365_p0 = scmp.ne.s32.totalorder %s479_s0, %s364_s18  ;;  %p368_p1 = scmp.lt.u32.totalorder %s364_s18, %s479_s0 }
   0x6   :  { %p370_p2 = pnand %p368_p1, %p365_p0 }
   0x8   :  { %373 = shalt.err (!%p370_p2)
}
   0x9   :  { %s374_s23 = scalar_lea.vmem %s17_s13, 128  ;;  %p379_p4 = scmp.lt.s32.totalorder %s17_s13, %s17_s13 }
   0xa   :  { %p375_p3 = scmp.ne.s32.totalorder %s17_s13, %s374_s23  ;;  %p380_p5 = scmp.lt.s32.totalorder %s374_s23, %s374_s23 }
   0xc   :  { %p381_p6 = por %p380_p5, %p379_p4 }
   0xe   :  { %p382_p7 = pnand %p381_p6, %p375_p3 }
  0x10   :  { %385 = shalt.err (!%p382_p7)
}
  0x11   :  { %19 = dma.hbm_to_vmem [thread:$0]  %s479_s0, 128, %s17_s13, [#allocation3]  }
  0x12   :  { %s386_s28 = scalar_lea.hbm %s480_s1, 1280 }
  0x13   :  { %p387_p8 = scmp.ne.s32.totalorder %s480_s1, %s386_s28  ;;  %p390_p9 = scmp.lt.u32.totalorder %s386_s28, %s480_s1 }
  0x15   :  { %p392_p10 = pnand %p390_p9, %p387_p8 }
  0x17   :  { %395 = shalt.err (!%p392_p10)
}
  0x18   :  { %s396_s6 = scalar_lea.vmem %s439_s15, 1280  ;;  %p401_p12 = scmp.lt.s32.totalorder %s439_s15, %s439_s15 }
  0x19   :  { %p397_p11 = scmp.ne.s32.totalorder %s439_s15, %s396_s6  ;;  %p402_p13 = scmp.lt.s32.totalorder %s396_s6, %s396_s6 }
  0x1b   :  { %p403_p0 = por %p402_p13, %p401_p12 }
  0x1d   :  { %p404_p1 = pnand %p403_p0, %p397_p11 }
  0x1f   :  { %407 = shalt.err (!%p404_p1)
}
  0x20   :  { %s414_s0 = smov 64   ;;  %s415_s7 = smov 4  }
  0x21   :  { %31 = dma.hbm_to_vmem [thread:$0]  %s480_s1, 1280, %s439_s15, [#allocation5], %s414_s0, %s414_s0, %s415_s7  }
  0x22   :  { %408 = dma.done.wait [#allocation3], 128  }
  0x23   :  { %409 = vsyncadd [#allocation3], 4294967168 }
  0x24   :  { %410 = dma.done.wait [#allocation5], 1280  }
  0x25   :  { %411 = vsyncadd [#allocation5], 4294966016  ;;  %v416_v0 = vmov 0.0   ;;  %vm417_vm0 = vmmov 0   ;;  %v418_v1 = vmov 0.0|0.0   ;;  %v362_v2 = vld [vmem:[#allocation4] sm:$0xff]  }
  0x26   :  { %288 = vmatprep.subr.bf16.mxu0 %v416_v0  ;;  %292 = vmatprep.mubr.msk.bf16.mxu0 %vm417_vm0, %v416_v0  ;;  %v363_v3 = vld [vmem:[#allocation4 + $0x8] sm:$0xff]   ;;  %v41_v4 = vld [vmem:[#allocation2] sm:$0xff]  ;;  %v260_v5 = vld [vmem:[#allocation4 + $0x10] sm:$0xff]   ;;  %vm64_vm1 = vcmask 261120  }
  0x27   :  { %331 = vmatprep.subr.bf16.mxu1 %v418_v1  ;;  %328 = vmatprep.mubr.msk.f32.mxu1 %vm417_vm0, %v416_v0  ;;  %v261_v6 = vld [vmem:[#allocation4 + $0x18] sm:$0xff]   ;;  %v42_v7 = vpack.c.bf16 %v41_v4, %v41_v4  ;;  %v262_v8 = vld [vmem:[#allocation4 + $0x20] sm:$0xff]   ;;  %v263_v9 = vld [vmem:[#allocation4 + $0x28] sm:$0xff]  }
  0x28   :  { %289 = vmatpush3.bf16.msra.mxu0 %v362_v2  ;;  %333 = vmatpush3.bf16.msra.mxu1 %v260_v5  ;;  %v264_v10 = vld [vmem:[#allocation4 + $0x30] sm:$0xff]   ;;  %v265_v11 = vld [vmem:[#allocation4 + $0x38] sm:$0xff]   ;;  %v266_v12 = vld [vmem:[#allocation4 + $0x40] sm:$0xff]  }
  0x29   :  { %290 = vmatprep.subr.bf16.mxu0 %v416_v0  ;;  %334 = vmatprep.subr.bf16.mxu1 %v418_v1  ;;  %v267_v13 = vld [vmem:[#allocation4 + $0x48] sm:$0xff]  }
  0x2a   :  { %v223_v14 = vld [vmem:[%s481_s2] ss:$0 sm:$0xff]  ;;  %v227_v21 = vld [vmem:[%s481_s2 + $0x1] ss:$0 sm:$0xff] }
  0x2c   :  { %291 = vmatpush3.bf16.msra.mxu0 %v363_v3  ;;  %336 = vmatpush3.bf16.msra.mxu1 %v261_v6 }
  0x2d   :  { %337 = vmatprep.subr.bf16.mxu1 %v418_v1 }
  0x2f   :  { %293 = vmatmul.mubr.msk.bf16.vlgmr.msra.gmra.mrb[0].mxu0 %vm64_vm1, %v42_v7 }
  0x30   :  { %339 = vmatpush3.bf16.msra.mxu1 %v262_v8 }
  0x31   :  { %340 = vmatprep.subr.bf16.mxu1 %v418_v1 }
  0x34   :  { %342 = vmatpush3.bf16.msra.mxu1 %v263_v9 }
  0x35   :  { %343 = vmatprep.subr.bf16.mxu1 %v418_v1 }
  0x38   :  { %345 = vmatpush3.bf16.msra.mxu1 %v264_v10 }
  0x39   :  { %346 = vmatprep.subr.bf16.mxu1 %v418_v1 }
  0x3c   :  { %348 = vmatpush3.bf16.msra.mxu1 %v265_v11 }
  0x3d   :  { %349 = vmatprep.subr.bf16.mxu1 %v418_v1 }
  0x40   :  { %351 = vmatpush3.bf16.msra.mxu1 %v266_v12 }
  0x41   :  { %352 = vmatprep.subr.bf16.mxu1 %v418_v1 }
  0x44   :  { %354 = vmatpush3.bf16.msra.mxu1 %v267_v13 }
 0x102   :  { %v102_v15 = vpop.f32.mrb[0].mxu0 }
 0x103   :  { %v103_v16 = vadd.f32 %v223_v14, %v102_v15  ;;  %v294_v17 = vpop.f32.mrb[1].mxu0 }
 0x104   :  { %v105_v18 = vpop.f32.mrb[2].mxu0 }
 0x105   :  { %v108_v19 = vmax.f32 %v103_v16, 0.0  ;;  %v295_v20 = vpop.f32.mrb[3].mxu0 }
 0x107   :  { %329 = vmatmul.mubr.f32.vlgmr.msra.gmra.mrb[0].mxu1 %v108_v19 }
 0x1da   :  { %v212_v22 = vpop.f32.mrb[0].mxu1 }
 0x1db   :  { %v213_v23 = vadd.f32 %v227_v21, %v212_v22  ;;  %v330_v24 = vpop.f32.mrb[1].mxu1 }
 0x1dd   :  { %216 = vst [vmem:[%s482_s3] sm:$0xff] %v213_v23 }
 0x1de   :  { %221 = vsyncpa [#allocation3], 1 }
 0x1df   :  { %222 = vsyncpa [#allocation5], 1 }

</bundles_post_ra>
